<compile_context>
chip_gen: v7x
topology: tpu7x:2x2x1
jax: 0.10.0
libtpu: 0.0.40
codegen_flags: <defaults>
</compile_context>

<pallas_src>
import jax
import jax.numpy as jnp
from jax.experimental import pallas as pl
from jax.experimental.pallas import tpu as pltpu

NUM_STATE = 28
HIDDEN = 100
HIDDEN_PAD = 128  # padded hidden width (full vreg lane width)


def _round_up(n: int, m: int) -> int:
    return ((n + m - 1) // m) * m


def critic_kernel(x_ref, w1_ref, b1_ref, w2_ref, b2_ref, o_ref):
    # x_ref : (TB, 28)   bf16 batch tile
    # w1_ref: (28, 128)  bf16 fc1 weight, hidden padded to 128 (resident)
    # b1_ref: (1, 128)   f32 fc1 bias (resident)
    # w2_ref: (1, 128)   f32 state_value weight as a row vector (resident)
    # b2_ref: (1,) SMEM  f32 state_value bias scalar
    # o_ref : (1, TB)    f32 lane-dense output block (batch on lanes)
    # fc1 on the MXU (bf16 operands, f32 accumulate); bias + ReLU on the VPU.
    h = jnp.dot(x_ref[...], w1_ref[...], preferred_element_type=jnp.float32)
    h = jnp.maximum(h + b1_ref[...], 0.0)                 # (TB, 128) f32
    # Second layer as VPU multiply + lane reduction (avoids a degenerate
    # N=1 MXU pass). Padded hidden columns are exactly zero, so the sum is
    # identical to the 100-wide contraction.
    v = jnp.sum(h * w2_ref[...], axis=-1) + b2_ref[0]     # (TB,)
    o_ref[...] = v[None, :].astype(o_ref.dtype)           # lane-dense store


def _choose_tile(B: int, block_b: int) -> int:
    """Batch tile: multiple of 128, capped at block_b, and for B > 128 picked
    so the grid has >= 2 steps (lets v7x shard the batch across both TCs)."""
    block_b = max(128, _round_up(block_b, 128))
    if B <= 128:
        return 128
    return min(block_b, _round_up(-(-B // 2), 128))


def critic_forward(x, w1, b1, w2, b2, *, block_b: int = 4096,
                   matmul_dtype=jnp.bfloat16):
    """x: (B, 28); w1: (28, 100); b1: (1, 100); w2: (100, 1); b2: (1, 1).

    Returns (B, 1) float32 state values, matching Critic.forward.
    """
    B = x.shape[0]
    TB = _choose_tile(B, block_b)
    G = pl.cdiv(B, TB)  # partial last block allowed -> no full-copy pad of x

    # Zero-pad the hidden dimension 100 -> 128 (result unchanged); weights
    # are tiny so these pads/casts are negligible.
    hp = HIDDEN_PAD - HIDDEN
    w1p = jnp.pad(w1, ((0, 0), (0, hp))).astype(matmul_dtype)        # (28,128)
    b1p = jnp.pad(b1.reshape(1, HIDDEN), ((0, 0), (0, hp))).astype(jnp.float32)
    w2p = jnp.pad(w2.reshape(1, HIDDEN), ((0, 0), (0, hp))).astype(jnp.float32)
    b2s = b2.reshape(1).astype(jnp.float32)                          # SMEM scalar

    # Cast the MXU operand stream to bf16 (no-op if x already arrives bf16
    # from upstream); all accumulation stays f32 inside the kernel.
    x_in = x if x.dtype == matmul_dtype else x.astype(matmul_dtype)

    itemsize = jnp.dtype(matmul_dtype).itemsize
    cost = pl.CostEstimate(
        flops=2 * B * NUM_STATE * HIDDEN_PAD + 4 * B * HIDDEN_PAD,
        transcendentals=0,
        bytes_accessed=B * NUM_STATE * itemsize + B * 4
        + (NUM_STATE * itemsize + 3 * 4) * HIDDEN_PAD,
    )

    out = pl.pallas_call(
        critic_kernel,
        out_shape=jax.ShapeDtypeStruct((1, B), jnp.float32),
        grid=(G,),
        in_specs=[
            pl.BlockSpec((TB, NUM_STATE), lambda i: (i, 0)),          # x tile
            pl.BlockSpec((NUM_STATE, HIDDEN_PAD), lambda i: (0, 0)),  # w1 resident
            pl.BlockSpec((1, HIDDEN_PAD), lambda i: (0, 0)),          # b1 resident
            pl.BlockSpec((1, HIDDEN_PAD), lambda i: (0, 0)),          # w2 resident
            pl.BlockSpec(memory_space=pltpu.SMEM),                    # b2 scalar
        ],
        out_specs=pl.BlockSpec((1, TB), lambda i: (0, i)),            # lane-dense
        compiler_params=pltpu.CompilerParams(
            dimension_semantics=("parallel",),  # shard batch grid on v7x 2xTC
        ),
        cost_estimate=cost,
    )(x_in, w1p, b1p, w2p, b2s)

    # Tiny layout plumbing back to the module's (B, 1) output.
    return out.reshape(B, 1)


def init_params(key):
    """Deterministic init mimicking PyTorch's default Linear init:
    U(-1/sqrt(fan_in), 1/sqrt(fan_in)) for both weights and biases."""
    k1, k2, k3, k4 = jax.random.split(key, 4)
    bound1 = 1.0 / jnp.sqrt(float(NUM_STATE))
    bound2 = 1.0 / jnp.sqrt(float(HIDDEN))
    w1 = jax.random.uniform(k1, (NUM_STATE, HIDDEN), jnp.float32, -bound1, bound1)
    b1 = jax.random.uniform(k2, (1, HIDDEN), jnp.float32, -bound1, bound1)
    w2 = jax.random.uniform(k3, (HIDDEN, 1), jnp.float32, -bound2, bound2)
    b2 = jax.random.uniform(k4, (1, 1), jnp.float32, -bound2, bound2)
    return w1, b1, w2, b2


if __name__ == "__main__":
    key = jax.random.PRNGKey(0)
    kx, kp = jax.random.split(key)

    # B=200 exercises the new no-pad path: 2 grid steps, partial last block.
    B = 200
    x = jax.random.normal(kx, (B, NUM_STATE), jnp.float32)
    w1, b1, w2, b2 = init_params(kp)

    value = jax.block_until_ready(critic_forward(x, w1, b1, w2, b2))
    assert value.shape == (B, 1)

    # Reference that emulates the kernel's bf16 MXU operands / f32 accumulate.
    xb = x.astype(jnp.bfloat16).astype(jnp.float32)
    w1b = w1.astype(jnp.bfloat16).astype(jnp.float32)
    ref_bf16 = jnp.maximum(xb @ w1b + b1, 0.0) @ w2 + b2
    assert jnp.allclose(value, ref_bf16, atol=1e-3, rtol=1e-3)

    # Full-f32 PyTorch-semantics reference (looser tol due to bf16 operands).
    ref_f32 = jnp.maximum(x @ w1 + b1, 0.0) @ w2 + b2
    assert jnp.allclose(value, ref_f32, atol=2e-2, rtol=2e-2)

    print("KERNEL_OK")
</pallas_src>

<mosaic_0001>
module attributes {stable_mosaic.version = 11 : i64} {
  func.func @critic_kernel(%arg0: i32, %arg1: memref<128x28xbf16, #tpu.memory_space<vmem>>, %arg2: memref<28x128xbf16, #tpu.memory_space<vmem>>, %arg3: memref<1x128xf32, #tpu.memory_space<vmem>>, %arg4: memref<1x128xf32, #tpu.memory_space<vmem>>, %arg5: memref<1xf32, #tpu.memory_space<smem>>, %arg6: memref<1x128xf32, #tpu.memory_space<vmem>>) attributes {dimension_semantics = [#tpu.dimension_semantics<parallel>], iteration_bounds = array<i64: 2>, scalar_prefetch = 0 : i64, scratch_operands = 0 : i64, tpu.core_type = #tpu.core_type<tc>, window_params = [{transform_indices = @transform_0, window_bounds = array<i64: 128, 28>}, {pipeline_mode = #tpu.pipeline_mode<synchronous>, transform_indices = @transform_1, window_bounds = array<i64: 28, 128>}, {pipeline_mode = #tpu.pipeline_mode<synchronous>, transform_indices = @transform_2, window_bounds = array<i64: 1, 128>}, {pipeline_mode = #tpu.pipeline_mode<synchronous>, transform_indices = @transform_3, window_bounds = array<i64: 1, 128>}, {transform_indices = @transform_4, window_bounds = array<i64: 1>}, {transform_indices = @transform_5, window_bounds = array<i64: 1, 128>}]} {
    %c0 = arith.constant 0 : index
    %c0_0 = arith.constant 0 : index
    %0 = vector.load %arg1[%c0, %c0_0] : memref<128x28xbf16, #tpu.memory_space<vmem>>, vector<128x28xbf16>
    %c0_1 = arith.constant 0 : index
    %c0_2 = arith.constant 0 : index
    %1 = vector.load %arg2[%c0_1, %c0_2] : memref<28x128xbf16, #tpu.memory_space<vmem>>, vector<28x128xbf16>
    %cst = arith.constant dense<0.000000e+00> : vector<128x128xf32>
    %2 = tpu.matmul %0, %1, %cst {dimension_numbers = #tpu.dot_dimension_numbers<[1], [0], [0], [1], [0, 0, 1, 1], [], []>} : vector<128x28xbf16>, vector<28x128xbf16>, vector<128x128xf32> -> vector<128x128xf32>
    %c0_3 = arith.constant 0 : index
    %c0_4 = arith.constant 0 : index
    %3 = vector.load %arg3[%c0_3, %c0_4] : memref<1x128xf32, #tpu.memory_space<vmem>>, vector<1x128xf32>
    %4 = vector.broadcast %3 : vector<1x128xf32> to vector<128x128xf32>
    %5 = arith.addf %2, %4 : vector<128x128xf32>
    %cst_5 = arith.constant 0.000000e+00 : f32
    %6 = vector.broadcast %cst_5 : f32 to vector<128x128xf32>
    %7 = arith.maximumf %5, %6 : vector<128x128xf32>
    %c0_6 = arith.constant 0 : index
    %c0_7 = arith.constant 0 : index
    %8 = vector.load %arg4[%c0_6, %c0_7] : memref<1x128xf32, #tpu.memory_space<vmem>>, vector<1x128xf32>
    %9 = vector.broadcast %8 : vector<1x128xf32> to vector<128x128xf32>
    %10 = arith.mulf %7, %9 : vector<128x128xf32>
    %cst_8 = arith.constant dense<0.000000e+00> : vector<128xf32>
    %11 = vector.multi_reduction <add>, %10, %cst_8 [1] : vector<128x128xf32> to vector<128xf32>
    %c0_9 = arith.constant 0 : index
    %12 = memref.load %arg5[%c0_9] : memref<1xf32, #tpu.memory_space<smem>>
    %13 = vector.broadcast %12 : f32 to vector<128xf32>
    %14 = arith.addf %11, %13 : vector<128xf32>
    %15 = vector.shape_cast %14 : vector<128xf32> to vector<1x128xf32>
    %c0_10 = arith.constant 0 : index
    %c0_11 = arith.constant 0 : index
    %16 = vector.load %arg6[%c0_10, %c0_11] : memref<1x128xf32, #tpu.memory_space<vmem>>, vector<1x128xf32>
    tpu.vector_store %arg6[%c0_10, %c0_11], %15 {strides = array<i32>} : memref<1x128xf32, #tpu.memory_space<vmem>>, vector<1x128xf32>,
    return
  }
  func.func @transform_0(%arg0: i32) -> (i32, i32) {
    %c0_i32 = arith.constant 0 : i32
    %c0_i32_0 = arith.constant 0 : i32
    return %arg0, %c0_i32 : i32, i32
  }
  func.func @transform_1(%arg0: i32) -> (i32, i32) {
    %c0_i32 = arith.constant 0 : i32
    %c0_i32_0 = arith.constant 0 : i32
    %c0_i32_1 = arith.constant 0 : i32
    return %c0_i32, %c0_i32_0 : i32, i32
  }
  func.func @transform_2(%arg0: i32) -> (i32, i32) {
    %c0_i32 = arith.constant 0 : i32
    %c0_i32_0 = arith.constant 0 : i32
    %c0_i32_1 = arith.constant 0 : i32
    return %c0_i32, %c0_i32_0 : i32, i32
  }
  func.func @transform_3(%arg0: i32) -> (i32, i32) {
    %c0_i32 = arith.constant 0 : i32
    %c0_i32_0 = arith.constant 0 : i32
    %c0_i32_1 = arith.constant 0 : i32
    return %c0_i32, %c0_i32_0 : i32, i32
  }
  func.func @transform_4(%arg0: i32) -> i32 {
    %c0_i32 = arith.constant 0 : i32
    %c0_i32_0 = arith.constant 0 : i32
    return %c0_i32 : i32
  }
  func.func @transform_5(%arg0: i32) -> (i32, i32) {
    %c0_i32 = arith.constant 0 : i32
    %c0_i32_0 = arith.constant 0 : i32
    return %c0_i32, %arg0 : i32, i32
  }
}

</mosaic_0001>

<bundles_post_ra>
// kernel: tpu_custom_call.1
= control target key start
LH: loop header
LB: loop body
LE: loop exit
PB: predicated region body
PF: predicated region fallthrough
CT: control target
= control target key end

     0   :  { %s1173_s0 = inlined_call_operand.vmem [shape: bf16[200,28], index: 0, kind: input, shape index: {}]   ;;  %s1174_s1 = inlined_call_operand.vmem [shape: bf16[28,128], index: 1, kind: input, shape index: {}]   ;;  %s1175_s2 = inlined_call_operand.vmem [shape: f32[1,128], index: 2, kind: input, shape index: {}]   ;;  %s1176_s3 = inlined_call_operand.vmem [shape: f32[1,128], index: 3, kind: input, shape index: {}]   ;;  %s1177_s4 = inlined_call_operand.<no memory space> [shape: f32[1], index: 4, kind: input, shape index: {}]   ;;  %s1178_s5 = inlined_call_operand.hbm [shape: f32[1,200], index: 5, kind: output, shape index: {}]  }
   0x1   :  { %10 = sst [smem:[#allocation2]] %s1177_s4 }
   0x2   :  { %11 = vsyncpa [#allocation4], 0 }
   0x3   :  { %13 = vsyncpa [#allocation4 + $0x1], 0  ;;  %s948_s20 = smov 0   ;;  %s950_s21 = smov 0  }
   0x4   :  { %s952_s22 = smov 0   ;;  %s954_s23 = smov 0  }
   0x5 LB: > { %s735_s4 = sadd.s32 4294967295, %s912_s23   ;;  %s736_s24 = sadd.s32 4294967294, %s912_s23   ;;  %s912_s23 = sphi %s954_s23, %s1184_s23   ;;  %s908_s22 = sphi %s952_s22, %s1183_s22   ;;  %s904_s21 = sphi %s950_s21, %s1182_s21   ;;  %s900_s20 = sphi %s948_s20, %s1181_s20  }
   0x6   : > { %s971_s25 = sadd.s32 1, %s912_s23   ;;  %s136_s26 = sadd.s32 1, %s908_s22 }
   0x7   : > { %s133_s27 = ssub.s32 %s912_s23, %s971_s25  ;;  %p146_p0 = scmp.ne.s32.totalorder %s908_s22, %s904_s21 }
   0x8   : > { %p134_p1 = scmp.eq.s32.totalorder %s133_s27, 0  ;;  %p147_p2 = scmp.eq.s32.totalorder %s735_s4, 1 }
   0x9   : > { %p152_p3 = scmp.ne.s32.totalorder %s904_s21, %s900_s20  ;;  %p153_p4 = scmp.eq.s32.totalorder %s736_s24, 1 }
   0xa   : > { %s981_s28 = scalar_select %p134_p1, %s908_s22, %s136_s26  }
   0xb   : > { %p983_p5 = por %p147_p2, %p146_p0  ;;  %p987_p6 = por %p153_p4, %p152_p3 }
   0xc   : > { %p739_p7 = scmp.ge.s32.totalorder %s912_s23, 1  ;;  %p200_p8 = scmp.lt.s32.totalorder %s912_s23, 3 }
   0xe   : > { %p201_p9 = pnand %p739_p7, %p200_p8 }
   0xf   : > { %v840_v0 = vld [vmem:[%s1174_s1] sm:$0xff] (!%p201_p9)   ;;  %vm349_vm0 = vcmask (!%p201_p9), 1045504   ;;  %v841_v1 = vld [vmem:[%s1174_s1 + $0x8] sm:$0x3f] (!%p201_p9)   ;;  %s999_s10 = sshll.u32 (!%p201_p9), %s735_s4, 4  ;;  %vm324_vm1 = vcmask (!%p201_p9), 228352  }
  0x10   : > { %204 = sbr.rel (%p201_p9) target bundleno = 438 (0x1b6), region = 40  ;;  %775 = vmatprep.subr.bf16.mxu0 (!%p201_p9), %v840_v0  ;;  %795 = vmatprep.subr.bf16.mxu1 (!%p201_p9), %v840_v0  ;;  %p236_p10 = scmp.lt.s32.totalorder (!%p201_p9), %s999_s10, 24  ;;  %v351_v2 = vsel (!%p201_p9), %vm349_vm0, %v841_v1, 0  ;;  %v1017_v11 = vld [vmem:[%s1175_s2] ss:$0 sm:$0xff] (!%p201_p9)  ;;  %vm566_vm2 = vcmask (!%p201_p9), 130112  }
  0x11   : > { %776 = vmatpush3.bf16.msra.mxu0 (!%p201_p9), %v840_v0  ;;  %797 = vmatpush3.bf16.msra.mxu1 (!%p201_p9), %v840_v0  ;;  %v1024_v18 = vld [vmem:[%s1176_s3] ss:$0 sm:$0xff] (!%p201_p9)  ;;  %s521_s4 = sld [smem:[#allocation2]] (!%p201_p9)  ;;  %vm573_vm3 = vcmask (!%p201_p9), 195712   ;;  %vm580_vm4 = vcmask (!%p201_p9), 261312   ;;  %vm587_vm5 = vcmask (!%p201_p9), 326912   ;;  %s1129_s8 = scalar_lea.hbm (!%p201_p9), %s1178_s5, %s999_s10 }
  0x12   : > { %799 = vmatprep.subr.msk.bf16.mxu0 (!%p201_p9), %vm349_vm0, %v841_v1  ;;  %800 = vmatprep.subr.msk.bf16.mxu1 (!%p201_p9), %vm349_vm0, %v841_v1  ;;  %vm594_vm6 = vcmask (!%p201_p9), 392512   ;;  %vm601_vm7 = vcmask (!%p201_p9), 458112   ;;  %vm608_vm8 = vcmask (!%p201_p9), 523712   ;;  %vm615_vm9 = vcmask (!%p201_p9), 589312   ;;  %s229_s24 = sand.u32 (!%p201_p9), 1, %s904_s21  }
  0x13   : > { %vm622_vm10 = vcmask (!%p201_p9), 654912   ;;  %vm629_vm11 = vcmask (!%p201_p9), 720512   ;;  %vm636_vm12 = vcmask (!%p201_p9), 786112   ;;  %vm643_vm13 = vcmask (!%p201_p9), 851712   ;;  %s230_s26 = scalar_lea.vmem (!%p201_p9), [#allocation3], %s229_s24  ;;  %s669_s9 = scalar_lea.sflag (!%p201_p9), [#allocation4], %s229_s24 }
  0x14   : > { %vm650_vm14 = vcmask (!%p201_p9), 917312   ;;  %vm657_vm15 = vcmask (!%p201_p9), 982912   ;;  %s681_s27 = sshll.u32 (!%p201_p9), %s230_s26, 4  ;;  %vm664_vm0 = vcmask (!%p201_p9), 1048512   ;;  %s1131_s27 = int_to_ptr.vmem [resolvable:$true] %s681_s27 }
  0x15   : > { %778 = vmatpush3.bf16.msra.mxu0 (!%p201_p9), %v351_v2  ;;  %798 = vmatpush3.bf16.msra.mxu1 (!%p201_p9), %v351_v2 }
  0x17   : > { %s237_s11 = scalar_select %p236_p10, %s999_s10, 24 }
  0x19   : > { %s741_s12 = sshll.u32 %s237_s11, 2  ;;  %s850_s11 = scalar_lea.vmem %s1131_s27, 16 }
  0x1a   : > { %s239_s15 = scalar_lea.vmem %s1173_s0, %s741_s12  ;;  %p851_p11 = scmp.ne.s32.totalorder %s1131_s27, %s850_s11 }
  0x1b   : > { %v842_v3 = vld [vmem:[%s239_s15] sm:$0xff]   ;;  %v843_v4 = vld [vmem:[%s239_s15 + $0x8] sm:$0xff]   ;;  %v846_v7 = vld [vmem:[%s239_s15 + $0x10] sm:$0xff]   ;;  %s914_s12 = smov [#allocation3]  }
  0x1c   : > { %779 = vmatprep.mubr.msk.bf16.mxu0 %vm324_vm1, %v842_v3  ;;  %v844_v5 = vld [vmem:[%s239_s15 + $0x20] sm:$0xff]   ;;  %v845_v6 = vld [vmem:[%s239_s15 + $0x28] sm:$0xff]   ;;  %v848_v8 = vld [vmem:[%s239_s15 + $0x30] sm:$0xff]   ;;  %p852_p12 = pnand %p851_p11, %p983_p5  ;;  %s854_s13 = sshll.u32 %s914_s12, 4  ;;  %s855_s13 = int_to_ptr.vmem [resolvable:$false] %s854_s13 }
  0x1d   : > { %780 = vmatmul.mubr.msk.bf16.vlgmr.msra.gmra.mrb[0].mxu0 %vm324_vm1, %v843_v4  ;;  %787 = vmatprep.mubr.msk.bf16.mxu1 %vm324_vm1, %v844_v5  ;;  %v847_v9 = vld [vmem:[%s239_s15 + $0x18] sm:$0xff]   ;;  %s856_s14 = scalar_lea.vmem %s855_s13, 32  ;;  %p857_p0 = scmp.lt.s32.totalorder %s1131_s27, %s855_s13 }
  0x1e   : > { %788 = vmatmul.mubr.msk.bf16.vlgmr.msra.gmra.mrb[0].mxu1 %vm324_vm1, %v845_v6  ;;  %783 = vmatprep.mubr.msk.bf16.mxu0 %vm324_vm1, %v846_v7  ;;  %v849_v10 = vld [vmem:[%s239_s15 + $0x38] sm:$0xff]   ;;  %p853_p13 = pneg %p852_p12  ;;  %p858_p1 = scmp.lt.s32.totalorder %s856_s14, %s850_s11 }
  0x1f   : > { %791 = vmatprep.mubr.msk.bf16.mxu1 %vm324_vm1, %v848_v8 }
  0x20   : > { %p859_p2 = por %p858_p1, %p857_p0 }
  0x22   : > { %p860_p3 = pnand %p859_p2, %p853_p13 }
  0x25   : > { %784 = vmatmul.mubr.msk.bf16.gmra.mrb[4].mxu0 %vm324_vm1, %v847_v9 }
  0x26   : > { %792 = vmatmul.mubr.msk.bf16.gmra.mrb[4].mxu1 %vm324_vm1, %v849_v10 }
  0xf0   : > { %v781_v12 = vpop.f32.mrb[0].mxu0 }
  0xf1   : > { %v396_v13 = vadd.f32 %v781_v12, %v1017_v11  ;;  %v387_v14 = vpop.f32.mrb[1].mxu0  ;;  %v789_v16 = vpop.f32.mrb[0].mxu1 }
  0xf2   : > { %v388_v15 = vadd.f32 %v1017_v11, %v387_v14  ;;  %v782_v17 = vpop.f32.mrb[2].mxu0  ;;  %v419_v21 = vpop.f32.mrb[1].mxu1  ;;  %v428_v57 = vadd.f32 %v789_v16, %v1017_v11 }
  0xf3   : > { %v452_v19 = vmax.f32 %v396_v13, 0.0  ;;  %v399_v20 = vadd.f32 %v782_v17, %v1017_v11  ;;  %v390_v22 = vpop.f32.mrb[3].mxu0  ;;  %v420_v24 = vadd.f32 %v1017_v11, %v419_v21  ;;  %v790_v25 = vpop.f32.mrb[2].mxu1 }
  0xf4   : > { %v450_v23 = vmax.f32 %v388_v15, 0.0  ;;  %v422_v27 = vpop.f32.mrb[3].mxu1  ;;  %v391_v30 = vadd.f32 %v1017_v11, %v390_v22  ;;  %v431_v55 = vadd.f32 %v790_v25, %v1017_v11  ;;  %v460_v62 = vmax.f32 %v428_v57, 0.0 }
  0xf5   : > { %v453_v26 = vmax.f32 %v399_v20, 0.0  ;;  %v475_v28 = vmul.f32 %v1024_v18, %v452_v19  ;;  %v458_v29 = vmax.f32 %v420_v24, 0.0  ;;  %v423_v31 = vadd.f32 %v1017_v11, %v422_v27 }
  0xf6   : > { %v473_v32 = vmul.f32 %v1024_v18, %v450_v23  ;;  %v451_v39 = vmax.f32 %v391_v30, 0.0  ;;  %v461_v60 = vmax.f32 %v431_v55, 0.0  ;;  %v483_v6 = vmul.f32 %v1024_v18, %v460_v62 }
  0xf7   : > { %493 = vadd.xlane.f32.xlu1 %v475_v28  ;;  %v481_v34 = vmul.f32 %v1024_v18, %v458_v29  ;;  %v459_v35 = vmax.f32 %v423_v31, 0.0  ;;  %v476_v38 = vmul.f32 %v1024_v18, %v453_v26  ;;  %v1061_v22 = vstv %s521_s4 }
  0xf8   : > { %489 = vadd.xlane.f32.xlu0 %v473_v32  ;;  %v785_v33 = vpop.f32.mrb[4].mxu0  ;;  %v474_v52 = vmul.f32 %v1024_v18, %v451_v39  ;;  %v484_v3 = vmul.f32 %v1024_v18, %v461_v60 }
  0xf9   : > { %v412_v36 = vadd.f32 %v785_v33, %v1017_v11  ;;  %v403_v37 = vpop.f32.mrb[5].mxu0  ;;  %v793_v41 = vpop.f32.mrb[4].mxu1  ;;  %v482_v49 = vmul.f32 %v1024_v18, %v459_v35 }
  0xfa   : > { %v786_v40 = vpop.f32.mrb[6].mxu0  ;;  %v435_v44 = vpop.f32.mrb[5].mxu1  ;;  %v404_v51 = vadd.f32 %v1017_v11, %v403_v37  ;;  %v444_v4 = vadd.f32 %v793_v41, %v1017_v11 }
  0xfb   : > { %495 = vadd.xlane.f32.xlu1 %v476_v38  ;;  %v415_v42 = vadd.f32 %v786_v40, %v1017_v11  ;;  %v406_v43 = vpop.f32.mrb[7].mxu0  ;;  %v456_v45 = vmax.f32 %v412_v36, 0.0  ;;  %v794_v46 = vpop.f32.mrb[6].mxu1  ;;  %v436_v63 = vadd.f32 %v1017_v11, %v435_v44 }
  0xfc   : > { %505 = vadd.xlane.f32.xlu0 %v481_v34  ;;  %v407_v48 = vadd.f32 %v1017_v11, %v406_v43  ;;  %v438_v50 = vpop.f32.mrb[7].mxu1  ;;  %v454_v58 = vmax.f32 %v404_v51, 0.0  ;;  %v447_v2 = vadd.f32 %v794_v46, %v1017_v11  ;;  %v464_v9 = vmax.f32 %v444_v4, 0.0 }
  0xfd   : > { %v457_v47 = vmax.f32 %v415_v42, 0.0  ;;  %v479_v54 = vmul.f32 %v1024_v18, %v456_v45  ;;  %v439_v59 = vadd.f32 %v1017_v11, %v438_v50  ;;  %v462_v5 = vmax.f32 %v436_v63, 0.0 }
  0xfe   : > { %v455_v56 = vmax.f32 %v407_v48, 0.0  ;;  %v477_v0 = vmul.f32 %v1024_v18, %v454_v58  ;;  %v465_v8 = vmax.f32 %v447_v2, 0.0  ;;  %v487_v13 = vmul.f32 %v1024_v18, %v464_v9 }
  0xff   : > { %507 = vadd.xlane.f32.xlu1 %v482_v49  ;;  %v480_v53 = vmul.f32 %v1024_v18, %v457_v47  ;;  %v463_v1 = vmax.f32 %v439_v59, 0.0  ;;  %v485_v10 = vmul.f32 %v1024_v18, %v462_v5  ;;  %v555_v11 = vlaneseq }
 0x100   : > { %491 = vadd.xlane.f32.xlu0 %v474_v52  ;;  %v478_v61 = vmul.f32 %v1024_v18, %v455_v56  ;;  %v488_v12 = vmul.f32 %v1024_v18, %v465_v8 }
 0x101   : > { %v486_v7 = vmul.f32 %v1024_v18, %v463_v1  ;;  %v1056_v16 = vand.u32 127, %v555_v11  ;;  %v1059_v20 = vshrl.u32 %v555_v11, 7 }
 0x103   : > { %503 = vadd.xlane.f32.xlu1 %v480_v53  ;;  %v561_v19 = vadd.s32 4294967288, %v1056_v16  ;;  %v568_v23 = vadd.s32 4294967280, %v1056_v16  ;;  %v559_v25 = vsub.s32 %v1056_v16, %v1059_v20  ;;  %v575_v27 = vadd.s32 4294967272, %v1056_v16 }
 0x104   : > { %501 = vadd.xlane.f32.xlu0 %v479_v54  ;;  %v610_v28 = vadd.s32 4294967232, %v1056_v16  ;;  %v1071_v30 = vadd.s32 4294967224, %v1056_v16  ;;  %v603_v32 = vadd.s32 4294967240, %v1056_v16  ;;  %v596_v34 = vadd.s32 4294967248, %v1056_v16 }
 0x105   : > { %v564_v18 = vsub.s32 %v561_v19, %v1059_v20  ;;  %v571_v33 = vsub.s32 %v568_v23, %v1059_v20  ;;  %v589_v38 = vadd.s32 4294967256, %v1056_v16  ;;  %v582_v39 = vadd.s32 4294967264, %v1056_v16 }
 0x106   : > { %v578_v41 = vsub.s32 %v575_v27, %v1059_v20  ;;  %v613_v42 = vsub.s32 %v610_v28, %v1059_v20  ;;  %v620_v44 = vsub.s32 %v1071_v30, %v1059_v20  ;;  %v606_v45 = vsub.s32 %v603_v32, %v1059_v20 }
 0x107   : > { %499 = vadd.xlane.f32.xlu1 %v478_v61  ;;  %v631_v46 = vadd.s32 4294967208, %v1056_v16  ;;  %v599_v49 = vsub.s32 %v596_v34, %v1059_v20  ;;  %v624_v50 = vadd.s32 4294967216, %v1056_v16  ;;  %v592_v52 = vsub.s32 %v589_v38, %v1059_v20 }
 0x108   : > { %497 = vadd.xlane.f32.xlu0 %v477_v0  ;;  %v585_v54 = vsub.s32 %v582_v39, %v1059_v20  ;;  %v645_v0 = vadd.s32 4294967192, %v1056_v16  ;;  %v638_v4 = vadd.s32 4294967200, %v1056_v16  ;;  %v659_v27 = vadd.s32 4294967176, %v1056_v16 }
 0x109   : > { %v634_v60 = vsub.s32 %v631_v46, %v1059_v20  ;;  %v627_v63 = vsub.s32 %v624_v50, %v1059_v20 }
 0x10a   : > { %v641_v23 = vsub.s32 %v638_v4, %v1059_v20  ;;  %v662_v38 = vsub.s32 %v659_v27, %v1059_v20 }
 0x10b   : > { %511 = vadd.xlane.f32.xlu1 %v484_v3 }
 0x10c   : > { %509 = vadd.xlane.f32.xlu0 %v483_v6 }
 0x10f   : > { %515 = vadd.xlane.f32.xlu1 %v486_v7 }
 0x110   : > { %513 = vadd.xlane.f32.xlu0 %v485_v10 }
 0x113   : > { %519 = vadd.xlane.f32.xlu1 %v488_v12 }
 0x114   : > { %517 = vadd.xlane.f32.xlu0 %v487_v13 }
 0x184   : > { %v494_v14 = vpop.xlane.xlu1 %493 }
 0x185   : > { %v490_v15 = vpop.xlane.xlu0 %489  ;;  %v525_v35 = vadd.f32 %v1061_v22, %v494_v14 }
 0x186   : > { %v523_v26 = vadd.f32 %v1061_v22, %v490_v15  ;;  %v648_v15 = vsub.s32 %v645_v0, %v1059_v20 }
 0x187   : > { %v572_v51 = vrot.slane %v525_v35, %v571_v33 }
 0x188   : > { %v496_v17 = vpop.xlane.xlu1 %495  ;;  %v560_v40 = vrot.slane %v523_v26, %v559_v25 }
 0x189   : > { %v506_v21 = vpop.xlane.xlu0 %505  ;;  %v526_v47 = vadd.f32 %v1061_v22, %v496_v17 }
 0x18a   : > { %v531_v1 = vadd.f32 %v1061_v22, %v506_v21 }
 0x18b   : > { %v579_v61 = vrot.slane %v526_v47, %v578_v41 }
 0x18c   : > { %v508_v24 = vpop.xlane.xlu1 %507  ;;  %v614_v17 = vrot.slane %v531_v1, %v613_v42 }
 0x18d   : > { %v492_v29 = vpop.xlane.xlu0 %491  ;;  %v532_v5 = vadd.f32 %v1061_v22, %v508_v24  ;;  %v652_v24 = vadd.s32 4294967184, %v1056_v16 }
 0x18e   : > { %v524_v31 = vadd.f32 %v1061_v22, %v492_v29 }
 0x190   : > { %v565_v36 = vrot.slane %v524_v31, %v564_v18  ;;  %v504_v37 = vpop.xlane.xlu1 %503  ;;  %v621_v18 = vrot.slane %v532_v5, %v620_v44 }
 0x191   : > { %v502_v43 = vpop.xlane.xlu0 %501  ;;  %v530_v62 = vadd.f32 %v1061_v22, %v504_v37  ;;  %v655_v37 = vsub.s32 %v652_v24, %v1059_v20 }
 0x192   : > { %v567_v48 = vsel %vm566_vm2, %v565_v36, %v560_v40  ;;  %v529_v58 = vadd.f32 %v1061_v22, %v502_v43 }
 0x193   : > { %v574_v57 = vsel %vm573_vm3, %v572_v51, %v567_v48  ;;  %v607_v13 = vrot.slane %v530_v62, %v606_v45 }
 0x194   : > { %v500_v53 = vpop.xlane.xlu1 %499  ;;  %v581_v7 = vsel %vm580_vm4, %v579_v61, %v574_v57  ;;  %v600_v9 = vrot.slane %v529_v58, %v599_v49 }
 0x195   : > { %v528_v55 = vadd.f32 %v1061_v22, %v500_v53  ;;  %v498_v56 = vpop.xlane.xlu0 %497 }
 0x196   : > { %v527_v59 = vadd.f32 %v1061_v22, %v498_v56 }
 0x197   : > { %v593_v6 = vrot.slane %v528_v55, %v592_v52 }
 0x198   : > { %v586_v2 = vrot.slane %v527_v59, %v585_v54  ;;  %v512_v3 = vpop.xlane.xlu1 %511 }
 0x199   : > { %v510_v8 = vpop.xlane.xlu0 %509  ;;  %v534_v14 = vadd.f32 %v1061_v22, %v512_v3 }
 0x19a   : > { %v588_v10 = vsel %vm587_vm5, %v586_v2, %v581_v7  ;;  %v533_v12 = vadd.f32 %v1061_v22, %v510_v8 }
 0x19b   : > { %v595_v11 = vsel %vm594_vm6, %v593_v6, %v588_v10  ;;  %v635_v31 = vrot.slane %v534_v14, %v634_v60 }
 0x19c   : > { %v602_v19 = vsel %vm601_vm7, %v600_v9, %v595_v11  ;;  %v516_v21 = vpop.xlane.xlu1 %515  ;;  %v628_v29 = vrot.slane %v533_v12, %v627_v63 }
 0x19d   : > { %v609_v25 = vsel %vm608_vm8, %v607_v13, %v602_v19  ;;  %v514_v26 = vpop.xlane.xlu0 %513  ;;  %v536_v33 = vadd.f32 %v1061_v22, %v516_v21 }
 0x19e   : > { %v616_v28 = vsel %vm615_vm9, %v614_v17, %v609_v25  ;;  %v535_v30 = vadd.f32 %v1061_v22, %v514_v26 }
 0x19f   : > { %v623_v32 = vsel %vm622_vm10, %v621_v18, %v616_v28  ;;  %v649_v43 = vrot.slane %v536_v33, %v648_v15 }
 0x1a0   : > { %v630_v34 = vsel %vm629_vm11, %v628_v29, %v623_v32  ;;  %v642_v35 = vrot.slane %v535_v30, %v641_v23  ;;  %v520_v36 = vpop.xlane.xlu1 %519 }
 0x1a1   : > { %v637_v16 = vsel %vm636_vm12, %v635_v31, %v630_v34  ;;  %v538_v39 = vadd.f32 %v1061_v22, %v520_v36  ;;  %v518_v40 = vpop.xlane.xlu0 %517 }
 0x1a2   : > { %v644_v41 = vsel %vm643_vm13, %v642_v35, %v637_v16  ;;  %v537_v42 = vadd.f32 %v1061_v22, %v518_v40 }
 0x1a3   : > { %v663_v45 = vrot.slane %v538_v39, %v662_v38  ;;  %v651_v46 = vsel %vm650_vm14, %v649_v43, %v644_v41 }
 0x1a4   : > { %v656_v44 = vrot.slane %v537_v42, %v655_v37 }
 0x1a6   : > { %v658_v47 = vsel %vm657_vm15, %v656_v44, %v651_v46 }
 0x1a7   : > { %v665_v20 = vsel %vm664_vm0, %v663_v45, %v658_v47 }
 0x1a8   : > { %667 = vst [vmem:[%s230_s26] sm:$0x1] %v665_v20 }
 0x1a9   : > { %863 = shalt.err (!%p860_p3)
}
 0x1aa   : > { %s864_s10 = scalar_lea.hbm %s1129_s8, 16  ;;  %s868_s17 = scalar_lea.hbm %s1178_s5, 32 }
 0x1ab   : > { %p865_p4 = scmp.ne.s32.totalorder %s1129_s8, %s864_s10  ;;  %p869_p9 = scmp.lt.u32.totalorder %s1129_s8, %s1178_s5 }
 0x1ac   : > { %p870_p10 = scmp.lt.u32.totalorder %s868_s17, %s864_s10  ;;  %p872_p12 = scmp.lt.u32.totalorder %s864_s10, %s1129_s8 }
 0x1ad   : > { %p866_p7 = pnand %p865_p4, %p983_p5 }
 0x1ae   : > { %p871_p11 = por %p870_p10, %p869_p9 }
 0x1af   : > { %p867_p8 = pneg %p866_p7 }
 0x1b0   : > { %p873_p13 = por %p872_p12, %p871_p11 }
 0x1b2   : > { %p874_p0 = pnand %p873_p13, %p867_p8 }
 0x1b4   : > { %877 = shalt.err (!%p874_p0)
}
 0x1b5   : > { %801 = dma.vmem_to_hbm [thread:$0]  (%p983_p5), %s1131_s27, 16, %s1129_s8, %s669_s9  }
 0x1b6 PF: > { %p807_p1 = scmp.ge.s32.totalorder %s912_s23, 2  ;;  %s693_s4 = sand.u32 1, %s900_s20  }
 0x1b7   : > { %s694_s24 = scalar_lea.sflag [#allocation4], %s693_s4 }
 0x1b8   : > { %p804_p2 = pnand %p807_p1, %p987_p6 }
 0x1ba   : > { %895 = dma.done.wait (!%p804_p2), %s694_s24, 16  }
 0x1bb   : > { %897 = vsyncadd (!%p804_p2), %s694_s24, 4294967280  ;;  %p16_p3 = scmp.ge.s32.totalorder %s971_s25, 4   ;;  %s1181_s20 = smov %s904_s21 }
 0x1bc   : > { %s1182_s21 = smov %s908_s22  ;;  %s1183_s22 = smov %s981_s28 }
 0x1bd   : > { %s1184_s23 = smov %s971_s25  ;;  %18 = sbr.rel (!%p16_p3) target bundleno = 5 (0x5), region = 75 }
 0x1c4   :  { %698 = vsyncpa [#allocation4], 1 }
 0x1c5   :  { %700 = vsyncpa [#allocation4 + $0x1], 1 }

</bundles_post_ra>
